<compile_context>
chip_gen: v6e
topology: v6e:2x2x1
jax: 0.10.0
libtpu: 0.0.40
codegen_flags: <defaults>
</compile_context>

<pallas_src>
import functools

import jax
import jax.numpy as jnp
from jax.experimental import pallas as pl
from jax.experimental.pallas import tpu as pltpu


def _pool_kernel(flen_ref,            # SMEM (B,) int32, scalar-prefetch
                 wav_ref,             # VMEM (S_pad, n_blocks_pad) f32, per-b resident
                 wft_ref,             # VMEM (H, n_taps*S_pad) conv weights (transposed)
                 bft_ref,             # VMEM (H, 1) conv bias (transposed)
                 out_ref,             # VMEM (H, 1) masked pooled SUM for sample b
                 acc_ref,             # VMEM scratch (H, tile_t) f32 row-partials
                 *, tile_t, n_taps, lookahead, conv_dtype):
    b = pl.program_id(0)
    t = pl.program_id(1)
    n_t = pl.num_programs(1)
    t0 = pl.multiple_of(t * tile_t, tile_t)
    flen = flen_ref[b]                               # valid frame count (int32)

    @pl.when(t == 0)
    def _init():
        acc_ref[...] = jnp.zeros_like(acc_ref)

    # Skip T tiles that lie entirely beyond this sample's valid frames.
    @pl.when(t0 < flen)
    def _accumulate():
        # One aligned load per tile; shifted tap views are static in-register
        # slices of it (no unaligned VMEM loads).
        wide = wav_ref[:, pl.ds(t0, tile_t + lookahead)]     # (S_pad, tile_t+lookahead)
        slab = jnp.concatenate(
            [wide[:, j:j + tile_t] for j in range(n_taps)],
            axis=0)                                          # (n_taps*S_pad, tile_t)

        # Fused strided-conv as a single matmul: hidden on sublanes, time on lanes.
        hs_t = jnp.dot(wft_ref[...].astype(conv_dtype), slab.astype(conv_dtype),
                       preferred_element_type=jnp.float32)   # (H, tile_t)
        hs_t = jax.nn.gelu(hs_t + bft_ref[...])

        # Valid-frame mask along the lane (time) axis, from the SMEM scalar.
        lane_t = t0 + jax.lax.broadcasted_iota(jnp.int32, (1, tile_t), 1)
        mask = (lane_t < flen).astype(jnp.float32)

        # Pure-VPU row-partial accumulate (no per-tile cross-lane reduction).
        acc_ref[...] += hs_t * mask

    # One cross-lane reduction per sample, only on the last T tile.
    @pl.when(t == n_t - 1)
    def _finalize():
        out_ref[...] = jnp.sum(acc_ref[...], axis=1, keepdims=True)   # (H, 1)


def audio_erc_forward(waveforms, lengths, params, *, kernel_size=10, stride=5,
                      tile_t=256, conv_dtype=jnp.float32):
    """waveforms: (B, L) f32, lengths: (B,) i32. Returns logits (B, num_classes)."""
    B, L = waveforms.shape
    K, S = kernel_size, stride
    assert K % S == 0, "stand-in conv requires kernel_size % stride == 0"
    assert tile_t % 128 == 0, "tile_t must be lane-aligned"
    n_taps = K // S
    T = (L - K) // S + 1

    n_t_tiles = int(pl.cdiv(T, tile_t))
    T_pad = n_t_tiles * tile_t
    lookahead = -(-max(n_taps - 1, 1) // 128) * 128    # cross-tile overlap, lane-aligned
    n_blocks_pad = T_pad + lookahead
    L_pad = n_blocks_pad * S
    s_pad = -(-S // 8) * 8

    # Lane-dense waveform layout: (B, S_pad sublanes, frame-blocks on lanes).
    wav = waveforms.astype(jnp.float32)
    wav = jnp.pad(wav, ((0, 0), (0, max(0, L_pad - L))))[:, :L_pad]
    blocks_t = jnp.transpose(wav.reshape(B, n_blocks_pad, S), (0, 2, 1))
    blocks_t = jnp.pad(blocks_t, ((0, 0), (0, s_pad - S), (0, 0)))   # (B, s_pad, nb)

    # conv-output length map (frame domain), int32 for SMEM prefetch.
    flen = jnp.clip((lengths - K) // S + 1, 1, T).astype(jnp.int32)

    H = params['wf'].shape[1]
    assert H % 8 == 0
    # Transposed + zero-padded conv weights: wft[h, j*s_pad + s] = wf[j*S + s, h].
    wf3 = params['wf'].astype(jnp.float32).reshape(n_taps, S, H)
    wf3 = jnp.pad(wf3, ((0, 0), (0, s_pad - S), (0, 0)))
    wft = jnp.transpose(wf3, (2, 0, 1)).reshape(H, n_taps * s_pad)
    bft = params['bf'].astype(jnp.float32).reshape(1, H).T            # (H, 1)

    kernel = functools.partial(_pool_kernel, tile_t=tile_t, n_taps=n_taps,
                               lookahead=lookahead, conv_dtype=conv_dtype)

    grid_spec = pltpu.PrefetchScalarGridSpec(
        num_scalar_prefetch=1,
        grid=(B, n_t_tiles),
        in_specs=[
            # Per-sample waveform, resident across the T axis (re-DMA'd only
            # when b changes; ~32 B/frame so long audio still fits VMEM).
            pl.BlockSpec((None, s_pad, n_blocks_pad), lambda b, t, lens: (b, 0, 0)),
            pl.BlockSpec((H, n_taps * s_pad), lambda b, t, lens: (0, 0)),
            pl.BlockSpec((H, 1), lambda b, t, lens: (0, 0)),
        ],
        out_specs=pl.BlockSpec((None, H, 1), lambda b, t, lens: (b, 0, 0)),
        scratch_shapes=[pltpu.VMEM((H, tile_t), jnp.float32)],
    )

    # VMEM budget from actual buffer sizes instead of a blanket 32 MiB.
    blocks_bytes = s_pad * n_blocks_pad * 4
    weight_bytes = H * max(n_taps * s_pad, 128) * 4 + H * 128 * 4
    acc_bytes = H * tile_t * 4
    work_bytes = 6 * (n_taps * s_pad + H) * (tile_t + lookahead) * 4
    vmem_limit = 2 * blocks_bytes + 2 * weight_bytes + acc_bytes + work_bytes + (2 << 20)
    vmem_limit = int(min(max(vmem_limit, 4 << 20), 64 << 20))

    cost = pl.CostEstimate(
        flops=2 * B * T_pad * (n_taps * s_pad) * H,
        transcendentals=B * T_pad * H,
        bytes_accessed=B * blocks_bytes + H * (n_taps * s_pad + 1) * 4 + B * H * 4)

    pooled_sum = pl.pallas_call(
        kernel,
        out_shape=jax.ShapeDtypeStruct((B, H, 1), jnp.float32),
        grid_spec=grid_spec,
        compiler_params=pltpu.CompilerParams(
            dimension_semantics=("parallel", "arbitrary"),
            vmem_limit_bytes=vmem_limit),
        cost_estimate=cost,
    )(flen, blocks_t, wft, bft)

    # Exact masked mean + classifier head as batched XLA matmuls over (B, H):
    # fills MXU rows, frees kernel VMEM (no resident head weights).
    pooled = pooled_sum[:, :, 0] / flen.astype(jnp.float32)[:, None]
    h1 = jnp.tanh(pooled @ params['w1'].astype(jnp.float32)
                  + params['b1'].astype(jnp.float32))
    return h1 @ params['w2'].astype(jnp.float32) + params['b2'].astype(jnp.float32)


def reference_forward(waveforms, lengths, params, *, kernel_size=10, stride=5):
    """Pure-JAX reference for the correctness check."""
    B, L = waveforms.shape
    K, S = kernel_size, stride
    T = (L - K) // S + 1
    idx = jnp.arange(T)[:, None] * S + jnp.arange(K)[None, :]
    frames = waveforms[:, idx].astype(jnp.float32)
    hs = jax.nn.gelu(jnp.einsum('btk,kh->bth', frames, params['wf'])
                     + params['bf'])
    flen = jnp.clip((lengths - K) // S + 1, 1, T).astype(jnp.float32)
    mask = (jnp.arange(T)[None, :] < flen[:, None]).astype(jnp.float32)
    pooled = jnp.einsum('bt,bth->bh', mask, hs) / flen[:, None]
    h1 = jnp.tanh(pooled @ params['w1'] + params['b1'])
    return h1 @ params['w2'] + params['b2']


if __name__ == "__main__":
    B = 2
    K, S = 10, 5            # stand-in conv kernel / stride
    H = 32                  # hidden size (encoder_embed_dim stand-in)
    NUM_CLASSES = 7
    T = 640                 # frames -> 3 T-tiles of 256
    L = (T - 1) * S + K     # 3205 raw samples

    key = jax.random.PRNGKey(0)
    k_wav, k_wf, k_bf, k_w1, k_b1, k_w2, k_b2 = jax.random.split(key, 7)

    waveforms = jax.random.normal(k_wav, (B, L), dtype=jnp.float32)
    # sample 1 is ragged: 239 valid frames -> its last two T tiles are skipped
    lengths = jnp.array([L, 1200], dtype=jnp.int32)

    params = {
        'wf': 0.1 * jax.random.normal(k_wf, (K, H), dtype=jnp.float32),
        'bf': 0.1 * jax.random.normal(k_bf, (1, H), dtype=jnp.float32),
        'w1': 0.1 * jax.random.normal(k_w1, (H, H), dtype=jnp.float32),
        'b1': 0.1 * jax.random.normal(k_b1, (1, H), dtype=jnp.float32),
        'w2': 0.1 * jax.random.normal(k_w2, (H, NUM_CLASSES), dtype=jnp.float32),
        'b2': 0.1 * jax.random.normal(k_b2, (1, NUM_CLASSES), dtype=jnp.float32),
    }

    out = audio_erc_forward(waveforms, lengths, params,
                            kernel_size=K, stride=S, tile_t=256)
    out = jax.block_until_ready(out)
    assert out.shape == (B, NUM_CLASSES), out.shape

    ref = reference_forward(waveforms, lengths, params, kernel_size=K, stride=S)
    assert jnp.allclose(out, ref, atol=1e-3, rtol=1e-3), (out, ref)

    print("KERNEL_OK")
</pallas_src>

<mosaic_0001>
module attributes {stable_mosaic.version = 11 : i64} {
  func.func @_pool_kernel(%arg0: i32, %arg1: i32, %arg2: memref<2xi32, #tpu.memory_space<smem>>, %arg3: memref<1x8x896xf32, #tpu.memory_space<vmem>>, %arg4: memref<32x16xf32, #tpu.memory_space<vmem>>, %arg5: memref<32x1xf32, #tpu.memory_space<vmem>>, %arg6: memref<1x32x1xf32, #tpu.memory_space<vmem>>, %arg7: memref<32x256xf32, #tpu.memory_space<vmem>>) attributes {dimension_semantics = [#tpu.dimension_semantics<parallel>, #tpu.dimension_semantics<arbitrary>], iteration_bounds = array<i64: 2, 3>, scalar_prefetch = 1 : i64, scratch_operands = 1 : i64, tpu.core_type = #tpu.core_type<tc>, window_params = [{transform_indices = @transform_0, window_bounds = array<i64: 1, 8, 896>}, {pipeline_mode = #tpu.pipeline_mode<synchronous>, transform_indices = @transform_1, window_bounds = array<i64: 32, 16>}, {pipeline_mode = #tpu.pipeline_mode<synchronous>, transform_indices = @transform_2, window_bounds = array<i64: 32, 1>}, {transform_indices = @transform_3, window_bounds = array<i64: 1, 32, 1>}]} {
    %c256_i32 = arith.constant 256 : i32
    %0 = arith.muli %arg1, %c256_i32 : i32
    %1 = tpu.assume_multiple %0, 256 : i32
    %2 = arith.index_cast %arg0 : i32 to index
    %3 = memref.load %arg2[%2] : memref<2xi32, #tpu.memory_space<smem>>
    %c0_i32 = arith.constant 0 : i32
    %4 = arith.cmpi eq, %arg1, %c0_i32 : i32
    %5 = arith.extui %4 : i1 to i32
    %c0_i32_0 = arith.constant 0 : i32
    %6 = arith.cmpi ne, %5, %c0_i32_0 : i32
    scf.if %6 {
      %cst = arith.constant 0.000000e+00 : f32
      %13 = vector.broadcast %cst : f32 to vector<32x256xf32>
      %c0 = arith.constant 0 : index
      %c0_3 = arith.constant 0 : index
      %14 = vector.load %arg7[%c0, %c0_3] : memref<32x256xf32, #tpu.memory_space<vmem>>, vector<32x256xf32>
      tpu.vector_store %arg7[%c0, %c0_3], %13 {strides = array<i32>} : memref<32x256xf32, #tpu.memory_space<vmem>>, vector<32x256xf32>,
    } else {
    }
    %7 = arith.cmpi slt, %1, %3 : i32
    %8 = arith.extui %7 : i1 to i32
    %c0_i32_1 = arith.constant 0 : i32
    %9 = arith.cmpi ne, %8, %c0_i32_1 : i32
    scf.if %9 {
      %c0 = arith.constant 0 : index
      %c0_3 = arith.constant 0 : index
      %13 = arith.index_cast %1 : i32 to index
      %14 = vector.load %arg3[%c0, %c0_3, %13] : memref<1x8x896xf32, #tpu.memory_space<vmem>>, vector<1x8x384xf32>
      %15 = vector.shape_cast %14 : vector<1x8x384xf32> to vector<8x384xf32>
      %16 = vector.extract_strided_slice %15 {offsets = [0, 0], sizes = [8, 256], strides = [1, 1]} : vector<8x384xf32> to vector<8x256xf32>
      %17 = vector.extract_strided_slice %15 {offsets = [0, 1], sizes = [8, 256], strides = [1, 1]} : vector<8x384xf32> to vector<8x256xf32>
      %18 = tpu.concatenate %16, %17 in 0 : vector<8x256xf32>, vector<8x256xf32> -> vector<16x256xf32>
      %c0_4 = arith.constant 0 : index
      %c0_5 = arith.constant 0 : index
      %19 = vector.load %arg4[%c0_4, %c0_5] : memref<32x16xf32, #tpu.memory_space<vmem>>, vector<32x16xf32>
      %cst = arith.constant dense<0.000000e+00> : vector<32x256xf32>
      %20 = tpu.matmul %19, %18, %cst {dimension_numbers = #tpu.dot_dimension_numbers<[1], [0], [0], [1], [0, 0, 1, 1], [], []>} : vector<32x16xf32>, vector<16x256xf32>, vector<32x256xf32> -> vector<32x256xf32>
      %c0_6 = arith.constant 0 : index
      %c0_7 = arith.constant 0 : index
      %21 = vector.load %arg5[%c0_6, %c0_7] : memref<32x1xf32, #tpu.memory_space<vmem>>, vector<32x1xf32>
      %22 = vector.broadcast %21 : vector<32x1xf32> to vector<32x256xf32>
      %23 = arith.addf %20, %22 : vector<32x256xf32>
      %24 = arith.mulf %23, %23 : vector<32x256xf32>
      %25 = arith.mulf %23, %24 : vector<32x256xf32>
      %cst_8 = arith.constant 4.471500e-02 : f32
      %26 = vector.broadcast %cst_8 : f32 to vector<32x256xf32>
      %27 = arith.mulf %26, %25 : vector<32x256xf32>
      %28 = arith.addf %23, %27 : vector<32x256xf32>
      %cst_9 = arith.constant 0.797884583 : f32
      %29 = vector.broadcast %cst_9 : f32 to vector<32x256xf32>
      %30 = arith.mulf %29, %28 : vector<32x256xf32>
      %31 = math.tanh %30 : vector<32x256xf32>
      %cst_10 = arith.constant 1.000000e+00 : f32
      %32 = vector.broadcast %cst_10 : f32 to vector<32x256xf32>
      %33 = arith.addf %32, %31 : vector<32x256xf32>
      %cst_11 = arith.constant 5.000000e-01 : f32
      %34 = vector.broadcast %cst_11 : f32 to vector<32x256xf32>
      %35 = arith.mulf %34, %33 : vector<32x256xf32>
      %36 = arith.mulf %23, %35 : vector<32x256xf32>
      %37 = tpu.iota {dimensions = array<i32: 1>} : vector<1x256xi32>
      %38 = vector.broadcast %1 : i32 to vector<1x256xi32>
      %39 = arith.addi %38, %37 : vector<1x256xi32>
      %40 = vector.broadcast %3 : i32 to vector<1x256xi32>
      %41 = arith.cmpi slt, %39, %40 : vector<1x256xi32>
      %42 = arith.extui %41 : vector<1x256xi1> to vector<1x256xi32>
      %43 = arith.sitofp %42 : vector<1x256xi32> to vector<1x256xf32>
      %c0_12 = arith.constant 0 : index
      %c0_13 = arith.constant 0 : index
      %44 = vector.load %arg7[%c0_12, %c0_13] : memref<32x256xf32, #tpu.memory_space<vmem>>, vector<32x256xf32>
      %45 = vector.broadcast %43 : vector<1x256xf32> to vector<32x256xf32>
      %46 = arith.mulf %36, %45 : vector<32x256xf32>
      %47 = arith.addf %44, %46 : vector<32x256xf32>
      %c0_14 = arith.constant 0 : index
      %c0_15 = arith.constant 0 : index
      %48 = vector.load %arg7[%c0_14, %c0_15] : memref<32x256xf32, #tpu.memory_space<vmem>>, vector<32x256xf32>
      tpu.vector_store %arg7[%c0_14, %c0_15], %47 {strides = array<i32>} : memref<32x256xf32, #tpu.memory_space<vmem>>, vector<32x256xf32>,
    } else {
    }
    %c2_i32 = arith.constant 2 : i32
    %10 = arith.cmpi eq, %arg1, %c2_i32 : i32
    %11 = arith.extui %10 : i1 to i32
    %c0_i32_2 = arith.constant 0 : i32
    %12 = arith.cmpi ne, %11, %c0_i32_2 : i32
    scf.if %12 {
      %c0 = arith.constant 0 : index
      %c0_3 = arith.constant 0 : index
      %13 = vector.load %arg7[%c0, %c0_3] : memref<32x256xf32, #tpu.memory_space<vmem>>, vector<32x256xf32>
      %cst = arith.constant dense<0.000000e+00> : vector<32xf32>
      %14 = vector.multi_reduction <add>, %13, %cst [1] : vector<32x256xf32> to vector<32xf32>
      %15 = vector.shape_cast %14 : vector<32xf32> to vector<32x1xf32>
      %c0_4 = arith.constant 0 : index
      %c0_5 = arith.constant 0 : index
      %c0_6 = arith.constant 0 : index
      %16 = vector.load %arg6[%c0_4, %c0_5, %c0_6] : memref<1x32x1xf32, #tpu.memory_space<vmem>>, vector<1x32x1xf32>
      %17 = vector.shape_cast %16 : vector<1x32x1xf32> to vector<32x1xf32>
      %18 = vector.shape_cast %15 : vector<32x1xf32> to vector<1x32x1xf32>
      tpu.vector_store %arg6[%c0_4, %c0_5, %c0_6], %18 {strides = array<i32>} : memref<1x32x1xf32, #tpu.memory_space<vmem>>, vector<1x32x1xf32>,
    } else {
    }
    return
  }
  func.func @transform_0(%arg0: i32, %arg1: i32, %arg2: memref<2xi32, #tpu.memory_space<smem>>) -> (i32, i32, i32) {
    %c0_i32 = arith.constant 0 : i32
    %c0_i32_0 = arith.constant 0 : i32
    %c0_i32_1 = arith.constant 0 : i32
    return %arg0, %c0_i32, %c0_i32_0 : i32, i32, i32
  }
  func.func @transform_1(%arg0: i32, %arg1: i32, %arg2: memref<2xi32, #tpu.memory_space<smem>>) -> (i32, i32) {
    %c0_i32 = arith.constant 0 : i32
    %c0_i32_0 = arith.constant 0 : i32
    %c0_i32_1 = arith.constant 0 : i32
    return %c0_i32, %c0_i32_0 : i32, i32
  }
  func.func @transform_2(%arg0: i32, %arg1: i32, %arg2: memref<2xi32, #tpu.memory_space<smem>>) -> (i32, i32) {
    %c0_i32 = arith.constant 0 : i32
    %c0_i32_0 = arith.constant 0 : i32
    %c0_i32_1 = arith.constant 0 : i32
    return %c0_i32, %c0_i32_0 : i32, i32
  }
  func.func @transform_3(%arg0: i32, %arg1: i32, %arg2: memref<2xi32, #tpu.memory_space<smem>>) -> (i32, i32, i32) {
    %c0_i32 = arith.constant 0 : i32
    %c0_i32_0 = arith.constant 0 : i32
    %c0_i32_1 = arith.constant 0 : i32
    return %arg0, %c0_i32, %c0_i32_0 : i32, i32, i32
  }
}

</mosaic_0001>

<bundles_post_ra>
// kernel: tpu_custom_call.1
= control target key start
LH: loop header
LB: loop body
LE: loop exit
PB: predicated region body
PF: predicated region fallthrough
CT: control target
= control target key end

     0   :  { %s1088_s0 = inlined_call_operand.vmem [shape: s32[2], index: 0, kind: input, shape index: {}]   ;;  %s1089_s1 = inlined_call_operand.hbm [shape: f32[2,8,896], index: 1, kind: input, shape index: {}]   ;;  %s1090_s2 = inlined_call_operand.vmem [shape: f32[32,16], index: 2, kind: input, shape index: {}]   ;;  %s1091_s3 = inlined_call_operand.vmem [shape: f32[32,1], index: 3, kind: input, shape index: {}]   ;;  %s1092_s4 = inlined_call_operand.vmem [shape: f32[2,32,1], index: 4, kind: output, shape index: {}]  }
   0x1   :  { %s9_s17 = sshll.u32 %s1088_s0, 4  ;;  %s10_s17 = int_to_ptr.vmem [resolvable:$true] %s9_s17 }
   0x2   :  { %s726_s18 = scalar_lea.vmem %s10_s17, 16  ;;  %p731_p1 = scmp.lt.s32.totalorder %s10_s17, %s10_s17 }
   0x3   :  { %p727_p0 = scmp.ne.s32.totalorder %s10_s17, %s726_s18  ;;  %p732_p2 = scmp.lt.s32.totalorder %s726_s18, %s726_s18 }
   0x5   :  { %p733_p3 = por %p732_p2, %p731_p1 }
   0x7   :  { %p734_p4 = pnand %p733_p3, %p727_p0 }
   0x9   :  { %737 = shalt.err (!%p734_p4)  }
   0xa   :  { %s836_s19 = smov [#allocation4]  }
   0xb   :  { %12 = dma.vmem_to_smem %s10_s17, 16, %s836_s19, [#allocation3] }
   0xc   :  { %798 = dma.done.wait [#allocation3], 16 }
   0xd   :  { %799 = vsyncadd [#allocation3], 4294967280 }
   0xe   :  { %14 = sfence }
   0xf   :  { %15 = vsyncpa [#allocation6], 0 }
  0x10   :  { %17 = vsyncpa [#allocation6 + $0x1], 0  ;;  %s870_s20 = smov 0   ;;  %s872_s21 = smov 0  }
  0x11   :  { %s874_s0 = smov 0   ;;  %s876_s22 = smov 0  }
  0x12   :  { %s878_s23 = smov 0   ;;  %s880_s24 = smov 0  }
  0x13   :  { %s882_s25 = smov 0   ;;  %s884_s26 = smov 0  }
  0x14 LB: > { %s603_s27 = sadd.s32 4294967295, %s834_s26   ;;  %s32_s28 = sadd.s32 1, %s826_s24  ;;  %s834_s26 = sphi %s884_s26, %s23_s26   ;;  %s830_s25 = sphi %s882_s25, %s1101_s25   ;;  %s826_s24 = sphi %s880_s24, %s1100_s24   ;;  %s822_s23 = sphi %s878_s23, %s1099_s23   ;;  %s818_s22 = sphi %s876_s22, %s1098_s22   ;;  %s814_s0 = sphi %s874_s0, %s1097_s0   ;;  %s810_s21 = sphi %s872_s21, %s1096_s21   ;;  %s806_s20 = sphi %s870_s20, %s1095_s20  }
  0x15   : > { %p33_p5 = scmp.ge.s32.totalorder %s32_s28, 3  ;;  %s35_s29 = sadd.s32 1, %s830_s25 }
  0x16   : > { %s42_s30 = sadd.s32 1, %s814_s0  ;;  %p49_p6 = scmp.ne.s32.totalorder %s814_s0, %s810_s21 }
  0x17   : > { %s1103_s28 = smov (%p33_p5, %s32_s28), 0  ;;  %s1105_s29 = smov (!%p33_p5, %s35_s29), %s830_s25 }
  0x18   : > { %p50_p7 = scmp.eq.s32.totalorder %s834_s26, 0  ;;  %p55_p8 = scmp.ne.s32.totalorder %s810_s21, %s806_s20 }
  0x19   : > { %p37_p9 = scmp.ge.s32.totalorder %s1105_s29, 2  ;;  %p56_p10 = scmp.eq.s32.totalorder %s603_s27, 0 }
  0x1a   : > { %p51_p11 = por %p50_p7, %p49_p6  ;;  %p638_p13 = scmp.lt.s32.totalorder %s834_s26, 6 }
  0x1b   : > { %s1107_s29 = smov (%p37_p9, %s1105_s29), 0  ;;  %p921_p12 = por %p56_p10, %p55_p8 }
  0x1c   : > { %s39_s6 = ssub.s32 %s830_s25, %s1107_s29  ;;  %s153_s7 = sand.u32 1, %s814_s0  }
  0x1d   : > { %p40_p0 = scmp.eq.s32.totalorder %s39_s6, 0  ;;  %s629_s8 = smul.u32 56, %s153_s7 }
  0x1e   : > { %p929_p1 = pnand %p638_p13, %p51_p11  ;;  %s630_s11 = smul.u32 896, %s830_s25 }
  0x1f   : > { %s934_s10 = scalar_select %p40_p0, %s814_s0, %s42_s30  }
  0x20   : > { %s157_s12 = scalar_lea.vmem [#allocation5], %s629_s8  ;;  %s163_s16 = scalar_lea.hbm %s1089_s1, %s630_s11 }
  0x21   : > { %s165_s13 = sshll.u32 %s157_s12, 4  ;;  %s154_s17 = scalar_lea.sflag [#allocation6], %s153_s7  ;;  %s166_s13 = int_to_ptr.vmem [resolvable:$true] %s165_s13 }
  0x22   : > { %p740_p2 = pneg %p929_p1  ;;  %s751_s18 = scalar_lea.vmem %s166_s13, 896 }
  0x23   : > { %p752_p3 = scmp.ne.s32.totalorder %s166_s13, %s751_s18  ;;  %s837_s19 = smov [#allocation5]  }
  0x24   : > { %s756_s20 = sshll.u32 %s837_s19, 4  ;;  %s757_s20 = int_to_ptr.vmem [resolvable:$false] %s756_s20 }
  0x25   : > { %p754_p4 = pnand %p752_p3, %p740_p2  ;;  %s758_s27 = scalar_lea.vmem %s757_s20, 1792 }
  0x26   : > { %p759_p6 = scmp.lt.s32.totalorder %s166_s13, %s757_s20  ;;  %p760_p7 = scmp.lt.s32.totalorder %s758_s27, %s751_s18 }
  0x27   : > { %p755_p5 = pneg %p754_p4 }
  0x28   : > { %p761_p8 = por %p760_p7, %p759_p6 }
  0x2a   : > { %p762_p9 = pnand %p761_p8, %p755_p5 }
  0x2c   : > { %765 = shalt.err (!%p762_p9)
}
  0x2d   : > { %637 = dma.hbm_to_vmem [thread:$0]  (!%p929_p1), %s163_s16, 896, %s166_s13, %s154_s17  }
  0x2e   : > { %p608_p10 = scmp.ge.s32.totalorder %s834_s26, 1  ;;  %p170_p11 = scmp.lt.s32.totalorder %s834_s26, 7 }
  0x30   : > { %p171_p13 = pnand %p608_p10, %p170_p11 }
  0x31   : > { %s176_s30 = sand.u32 (!%p171_p13), 1, %s810_s21  }
  0x32   : > { %174 = sbr.rel (%p171_p13) target bundleno = 594 (0x252), region = 32  ;;  %s177_s7 = scalar_lea.sflag (!%p171_p13), [#allocation6], %s176_s30 }
  0x33   : > { %s947_s6 = smul.u32 (!%p171_p13), 56, %s176_s30 }
  0x35   : > { %s180_s8 = scalar_lea.vmem (!%p171_p13), [#allocation5], %s947_s6 }
  0x37   : > { %801 = dma.done.wait (%p921_p12), %s177_s7, 896  }
  0x38   : > { %803 = vsyncadd (%p921_p12), %s177_s7, 4294966400  ;;  %p203_p0 = scmp.lt.s32.totalorder %s822_s23, 1  ;;  %s956_s9 = sshll.u32 %s818_s22, 8 }
  0x39   : > { %s959_s11 = sld [smem:[#allocation4 + %s822_s23]]  ;;  %p612_p1 = scmp.ne.s32.totalorder %s818_s22, 0 }
  0x3a   : > { %s1109_s23 = smov (!%p203_p0, %s822_s23), 1 }
  0x3b   : > { %s624_s12 = sshll.u32 %s1109_s23, 5  ;;  %213 = sbr.rel (%p612_p1) target bundleno = 69 (0x45), region = 40 }
  0x3c   : > { %s965_s15 = scalar_lea.vmem %s1092_s4, %s624_s12 }
  0x40   : > { %v838_v0 = vmov 0.0  }
  0x41   : > { %214 = vst [vmem:[#allocation2 + $0x30] sm:$0xff] %v838_v0  ;;  %215 = vst [vmem:[#allocation2] sm:$0xff] %v838_v0 }
  0x42   : > { %216 = vst [vmem:[#allocation2 + $0x18] sm:$0xff] %v838_v0  ;;  %217 = vst [vmem:[#allocation2 + $0x10] sm:$0xff] %v838_v0 }
  0x43   : > { %218 = vst [vmem:[#allocation2 + $0x8] sm:$0xff] %v838_v0  ;;  %219 = vst [vmem:[#allocation2 + $0x20] sm:$0xff] %v838_v0 }
  0x44   : > { %220 = vst [vmem:[#allocation2 + $0x28] sm:$0xff] %v838_v0  ;;  %221 = vst [vmem:[#allocation2 + $0x38] sm:$0xff] %v838_v0 }
  0x45 PF: > { %p613_p12 = scmp.ge.s32.totalorder %s956_s9, %s959_s11 }
  0x46   : > { %s226_s23 = sshra.s32 (!%p613_p12), %s956_s9, 7  ;;  %s840_s17 = smov (!%p613_p12), 127  }
  0x47   : > { %225 = sbr.rel (%p613_p12) target bundleno = 440 (0x1b8), region = 44  ;;  %s614_s5 = sshll.u32 (!%p613_p12), %s226_s23, 3 }
  0x48   : > { %s229_s16 = scalar_lea.vmem (!%p613_p12), %s180_s8, %s614_s5 [#allocation5] }
  0x4c   : > { %v839_v1 = vmov 0.0   ;;  %v231_v2 = vld [vmem:[%s229_s16 + $0x8] sm:$0xff]  ;;  %v230_v3 = vld [vmem:[%s229_s16] sm:$0xff]  ;;  %v232_v4 = vld [vmem:[%s229_s16 + $0x10] sm:$0xff]  ;;  %v841_v5 = vmov 0   ;;  %vm242_vm0 = vcmask 1039360  }
  0x4d   : > { %352 = vmatprep.mubr.f32.mxu0 %v839_v1  ;;  %364 = vmatprep.mubr.f32.mxu1 %v839_v1  ;;  %v251_v6 = vld [vmem:[%s1091_s3] sm:$0xff]  ;;  %v253_v7 = vld [vmem:[%s1091_s3 + $0x10] sm:$0xff]  ;;  %v252_v8 = vld [vmem:[%s1091_s3 + $0x8] sm:$0xff]  ;;  %vm275_vm1 = vcmask 130048  }
  0x4e   : > { %238 = vrot.lane.b32.xlu0 %v231_v2, %s840_s17  ;;  %236 = vrot.lane.b32.xlu1 %v230_v3, %s840_s17  ;;  %v254_v9 = vld [vmem:[%s1091_s3 + $0x18] sm:$0xff]  ;;  %v247_v15 = vld [vmem:[%s1090_s2] sm:$0xff] }
  0x4f   : > { %708 = vset.pattern.permute.xlu1 %v841_v5  ;;  %709 = vset.pattern.permute.xlu0 %v841_v5  ;;  %v249_v16 = vld [vmem:[%s1090_s2 + $0x10] sm:$0xff]  ;;  %v248_v17 = vld [vmem:[%s1090_s2 + $0x8] sm:$0xff]  ;;  %v250_v18 = vld [vmem:[%s1090_s2 + $0x18] sm:$0xff] }
  0x52   : > { %240 = vrot.lane.b32.xlu0 %v232_v4, %s840_s17  ;;  %257 = vperm.xlu1 %708, %v251_v6   ;;  %v449_v4 = vlaneseq }
  0x56   : > { %267 = vperm.xlu1 %708, %v253_v7   ;;  %262 = vperm.xlu0 %709, %v252_v8  }
  0x5a   : > { %272 = vperm.xlu1 %708, %v254_v9  }
  0xc0   : > { %v239_v10 = vpop.permute.xlu0 %238  ;;  %v237_v11 = vpop.permute.xlu1 %236 }
  0xc1   : > { %v243_v14 = vsel %vm242_vm0, %v237_v11, %v239_v10 }
  0xc4   : > { %v241_v12 = vpop.permute.xlu0 %240 }
  0xc5   : > { %v244_v13 = vsel %vm242_vm0, %v239_v10, %v241_v12 }
  0xc6   : > { %316 = vmatprep.subr.mxu0 %v244_v13  ;;  %625 = vmatprep.subr.mxu1 %v244_v13 }
  0xc7   : > { %317 = vmatpush1.msra.mxu0 %v243_v14  ;;  %627 = vmatpush1.msra.mxu1 %v243_v14  ;;  %v450_v14 = vand.u32 127, %v449_v4 }
  0xc8   : > { %318 = vmatprep.subr.mxu0 %v231_v2  ;;  %626 = vmatprep.subr.mxu1 %v231_v2 }
  0xc9   : > { %319 = vmatpush1.msra.mxu0 %v230_v3  ;;  %628 = vmatpush1.msra.mxu1 %v230_v3 }
  0xca   : > { %615 = vmatmul.mubr.msk.f32.vlgmr.msra.gmra.mxu0 %vm275_vm1, %v247_v15  ;;  %617 = vmatmul.mubr.msk.f32.vlgmr.msra.gmra.mxu1 %vm275_vm1, %v249_v16 }
  0xcb   : > { %358 = vmatprep.mubr.f32.mxu0 %v839_v1  ;;  %370 = vmatprep.mubr.f32.mxu1 %v839_v1 }
  0xcd   : > { %v258_v19 = vpop.permute.xlu1 %257 }
  0xce   : > { %616 = vmatmul.mubr.msk.f32.gmra.mxu0 %vm275_vm1, %v248_v17  ;;  %618 = vmatmul.mubr.msk.f32.gmra.mxu1 %vm275_vm1, %v250_v18  ;;  %v452_v18 = vstv %s956_s9 }
  0xd1   : > { %v268_v20 = vpop.permute.xlu1 %267  ;;  %v263_v31 = vpop.permute.xlu0 %262 }
  0xd5   : > { %v273_v34 = vpop.permute.xlu1 %272 }
 0x18a   : > { %v354_v21 = vpop.f32.mrf.mxu0  ;;  %v366_v22 = vpop.f32.mrf.mxu1 }
 0x18b   : > { %v999_v23 = vadd.f32 %v354_v21, %v258_v19  ;;  %v1001_v24 = vadd.f32 %v366_v22, %v268_v20  ;;  %v455_v21 = vstv %s959_s11 }
 0x18c   : > { %v356_v25 = vpop.f32.mrf.mxu0  ;;  %v368_v26 = vpop.f32.mrf.mxu1 }
 0x18d   : > { %v377_v27 = vmul.f32 %v999_v23, %v999_v23  ;;  %v381_v28 = vmul.f32 %v1001_v24, %v1001_v24  ;;  %v1007_v29 = vadd.f32 %v356_v25, %v258_v19  ;;  %v1009_v30 = vadd.f32 %v368_v26, %v268_v20 }
 0x18e   : > { %v360_v32 = vpop.f32.mrf.mxu0  ;;  %v372_v33 = vpop.f32.mrf.mxu1  ;;  %v451_v19 = vadd.s32 128, %v450_v14  ;;  %v453_v20 = vadd.s32 %v452_v18, %v450_v14 }
 0x18f   : > { %v385_v35 = vmul.f32 %v377_v27, %v999_v23  ;;  %v389_v36 = vmul.f32 %v381_v28, %v1001_v24  ;;  %v378_v37 = vmul.f32 %v1007_v29, %v1007_v29  ;;  %v382_v38 = vmul.f32 %v1009_v30, %v1009_v30 }
 0x190   : > { %v1017_v39 = vadd.f32 %v360_v32, %v263_v31  ;;  %v1019_v40 = vadd.f32 %v372_v33, %v273_v34  ;;  %v362_v41 = vpop.f32.mrf.mxu0  ;;  %v374_v42 = vpop.f32.mrf.mxu1  ;;  %v454_v22 = vadd.s32 %v452_v18, %v451_v19  ;;  %vm456_vm2 = vcmp.lt.s32.totalorder %v453_v20, %v455_v21 }
 0x191   : > { %v393_v43 = vmul.f32 0.044715, %v385_v35  ;;  %v397_v44 = vmul.f32 0.044715, %v389_v36  ;;  %v386_v45 = vmul.f32 %v378_v37, %v1007_v29  ;;  %v390_v46 = vmul.f32 %v382_v38, %v1009_v30 }
 0x192   : > { %v379_v47 = vmul.f32 %v1017_v39, %v1017_v39  ;;  %v383_v48 = vmul.f32 %v1019_v40, %v1019_v40  ;;  %v1027_v49 = vadd.f32 %v362_v41, %v263_v31  ;;  %v1029_v50 = vadd.f32 %v374_v42, %v273_v34 }
 0x193   : > { %v401_v51 = vadd.f32 %v393_v43, %v999_v23  ;;  %v405_v52 = vadd.f32 %v397_v44, %v1001_v24  ;;  %v394_v53 = vmul.f32 0.044715, %v386_v45  ;;  %v398_v54 = vmul.f32 0.044715, %v390_v46  ;;  %v462_v44 = vld [vmem:[#allocation2 + $0x30] sm:$0xff] }
 0x194   : > { %v387_v55 = vmul.f32 %v379_v47, %v1017_v39  ;;  %v391_v56 = vmul.f32 %v383_v48, %v1019_v40  ;;  %v380_v57 = vmul.f32 %v1027_v49, %v1027_v49  ;;  %v384_v58 = vmul.f32 %v1029_v50, %v1029_v50 }
 0x195   : > { %v409_v59 = vmul.f32 0.7978846, %v401_v51  ;;  %v413_v60 = vmul.f32 0.7978846, %v405_v52  ;;  %v402_v61 = vadd.f32 %v394_v53, %v1007_v29  ;;  %v406_v62 = vadd.f32 %v398_v54, %v1009_v30  ;;  %v466_v53 = vld [vmem:[#allocation2 + $0x8] sm:$0xff] }
 0x196   : > { %v395_v63 = vmul.f32 0.044715, %v387_v55  ;;  %v399_v0 = vmul.f32 0.044715, %v391_v56  ;;  %v388_v2 = vmul.f32 %v380_v57, %v1027_v49  ;;  %v392_v3 = vmul.f32 %v384_v58, %v1029_v50  ;;  %v463_v58 = vld [vmem:[#allocation2] sm:$0xff] }
 0x197   : > { %710 = vtanh.f32 %v409_v59  ;;  %v410_v5 = vmul.f32 0.7978846, %v402_v61  ;;  %v414_v6 = vmul.f32 0.7978846, %v406_v62  ;;  %vm457_vm3 = vcmp.lt.s32.totalorder %v454_v22, %v455_v21 }
 0x198   : > { %712 = vtanh.f32 %v413_v60  ;;  %v403_v7 = vadd.f32 %v395_v63, %v1017_v39  ;;  %v407_v8 = vadd.f32 %v399_v0, %v1019_v40  ;;  %v396_v9 = vmul.f32 0.044715, %v388_v2 }
 0x199   : > { %714 = vtanh.f32 %v410_v5  ;;  %v400_v10 = vmul.f32 0.044715, %v392_v3  ;;  %v619_v35 = vsel %vm456_vm2, 1.0, %v839_v1  ;;  %v620_v46 = vsel %vm457_vm3, 1.0, %v839_v1  ;;  %v464_v5 = vld [vmem:[#allocation2 + $0x18] sm:$0xff] }
 0x19a   : > { %716 = vtanh.f32 %v414_v6  ;;  %v411_v11 = vmul.f32 0.7978846, %v403_v7  ;;  %v415_v12 = vmul.f32 0.7978846, %v407_v8  ;;  %v404_v13 = vadd.f32 %v396_v9, %v1027_v49  ;;  %v468_v9 = vld [vmem:[#allocation2 + $0x28] sm:$0xff] }
 0x19b   : > { %v408_v15 = vadd.f32 %v400_v10, %v1029_v50 }
 0x19c   : > { %718 = vtanh.f32 %v411_v11  ;;  %v412_v16 = vmul.f32 0.7978846, %v404_v13 }
 0x19d   : > { %720 = vtanh.f32 %v415_v12  ;;  %v416_v17 = vmul.f32 0.7978846, %v408_v15  ;;  %v465_v12 = vld [vmem:[#allocation2 + $0x10] sm:$0xff]  ;;  %v469_v15 = vld [vmem:[#allocation2 + $0x38] sm:$0xff] }
 0x19e   : > { %722 = vtanh.f32 %v412_v16 }
 0x19f   : > { %724 = vtanh.f32 %v416_v17 }
 0x1a4   : > { %v711_v25 = vpop.eup %710 }
 0x1a5   : > { %v713_v26 = vpop.eup %712  ;;  %v425_v27 = vadd.f32 1.0, %v711_v25 }
 0x1a6   : > { %v715_v28 = vpop.eup %714  ;;  %v429_v31 = vadd.f32 1.0, %v713_v26 }
 0x1a7   : > { %v717_v32 = vpop.eup %716  ;;  %v433_v33 = vmul.f32 0.5, %v425_v27  ;;  %v426_v34 = vadd.f32 1.0, %v715_v28 }
 0x1a8   : > { %v437_v36 = vmul.f32 0.5, %v429_v31  ;;  %v430_v37 = vadd.f32 1.0, %v717_v32 }
 0x1a9   : > { %v719_v38 = vpop.eup %718  ;;  %v441_v41 = vmul.f32 %v433_v33, %v999_v23  ;;  %v434_v42 = vmul.f32 0.5, %v426_v34 }
 0x1aa   : > { %v721_v43 = vpop.eup %720  ;;  %v445_v45 = vmul.f32 %v437_v36, %v1001_v24  ;;  %v438_v47 = vmul.f32 0.5, %v430_v37  ;;  %v427_v48 = vadd.f32 1.0, %v719_v38  ;;  %v467_v24 = vld [vmem:[#allocation2 + $0x20] sm:$0xff] }
 0x1ab   : > { %v723_v51 = vpop.eup %722  ;;  %v470_v52 = vmul.f32 %v619_v35, %v441_v41  ;;  %v442_v54 = vmul.f32 %v434_v42, %v1007_v29  ;;  %v431_v55 = vadd.f32 1.0, %v721_v43 }
 0x1ac   : > { %v725_v56 = vpop.eup %724  ;;  %v474_v57 = vmul.f32 %v619_v35, %v445_v45  ;;  %v446_v23 = vmul.f32 %v438_v47, %v1009_v30  ;;  %v435_v59 = vmul.f32 0.5, %v427_v48  ;;  %v428_v60 = vadd.f32 1.0, %v723_v51 }
 0x1ad   : > { %v478_v61 = vadd.f32 %v470_v52, %v462_v44  ;;  %v471_v62 = vmul.f32 %v620_v46, %v442_v54  ;;  %v439_v63 = vmul.f32 0.5, %v431_v55  ;;  %v432_v1 = vadd.f32 1.0, %v725_v56 }
 0x1ae   : > { %v482_v0 = vadd.f32 %v474_v57, %v466_v53  ;;  %v475_v2 = vmul.f32 %v620_v46, %v446_v23  ;;  %v443_v3 = vmul.f32 %v435_v59, %v1017_v39  ;;  %v436_v4 = vmul.f32 0.5, %v428_v60 }
 0x1af   : > { %486 = vst [vmem:[#allocation2 + $0x30] sm:$0xff] %v478_v61  ;;  %v479_v29 = vadd.f32 %v471_v62, %v463_v58  ;;  %v447_v6 = vmul.f32 %v439_v63, %v1019_v40  ;;  %v440_v7 = vmul.f32 0.5, %v432_v1 }
 0x1b0   : > { %490 = vst [vmem:[#allocation2 + $0x8] sm:$0xff] %v482_v0  ;;  %v483_v30 = vadd.f32 %v475_v2, %v467_v24  ;;  %v472_v8 = vmul.f32 %v619_v35, %v443_v3  ;;  %v444_v10 = vmul.f32 %v436_v4, %v1027_v49 }
 0x1b1   : > { %487 = vst [vmem:[#allocation2] sm:$0xff] %v479_v29  ;;  %v476_v11 = vmul.f32 %v619_v35, %v447_v6  ;;  %v448_v13 = vmul.f32 %v440_v7, %v1029_v50 }
 0x1b2   : > { %491 = vst [vmem:[#allocation2 + $0x20] sm:$0xff] %v483_v30  ;;  %v480_v39 = vadd.f32 %v472_v8, %v464_v5  ;;  %v473_v14 = vmul.f32 %v620_v46, %v444_v10 }
 0x1b3   : > { %v484_v16 = vadd.f32 %v476_v11, %v468_v9  ;;  %v477_v17 = vmul.f32 %v620_v46, %v448_v13 }
 0x1b4   : > { %488 = vst [vmem:[#allocation2 + $0x18] sm:$0xff] %v480_v39  ;;  %v481_v40 = vadd.f32 %v473_v14, %v465_v12 }
 0x1b5   : > { %492 = vst [vmem:[#allocation2 + $0x28] sm:$0xff] %v484_v16  ;;  %v485_v18 = vadd.f32 %v477_v17, %v469_v15 }
 0x1b6   : > { %489 = vst [vmem:[#allocation2 + $0x10] sm:$0xff] %v481_v40 }
 0x1b7   : > { %493 = vst [vmem:[#allocation2 + $0x38] sm:$0xff] %v485_v18 }
 0x1b8 PF: > { %p621_p2 = scmp.ne.s32.totalorder %s818_s22, 2 }
 0x1ba   : > { %497 = sbr.rel (%p621_p2) target bundleno = 594 (0x252), region = 48 }
 0x1bf   : > { %v502_v49 = vld [vmem:[#allocation2 + $0x8] sm:$0xff]  ;;  %v503_v19 = vld [vmem:[#allocation2 + $0x20] sm:$0xff]  ;;  %v498_v20 = vld [vmem:[#allocation2 + $0x30] sm:$0xff]  ;;  %vm518_vm4 = vcmask 7168  }
 0x1c0   : > { %v512_v50 = vadd.f32 %v503_v19, %v502_v49  ;;  %v499_v21 = vld [vmem:[#allocation2] sm:$0xff]  ;;  %v504_v22 = vld [vmem:[#allocation2 + $0x28] sm:$0xff]  ;;  %v505_v25 = vld [vmem:[#allocation2 + $0x38] sm:$0xff] }
 0x1c1   : > { %v506_v26 = vadd.f32 %v499_v21, %v498_v20  ;;  %v500_v27 = vld [vmem:[#allocation2 + $0x18] sm:$0xff]  ;;  %v501_v28 = vld [vmem:[#allocation2 + $0x10] sm:$0xff]  ;;  %v515_v31 = vadd.f32 %v505_v25, %v504_v22 }
 0x1c2   : > { %513 = vadd.xlane.f32.xlu1 %v512_v50  ;;  %v509_v32 = vadd.f32 %v501_v28, %v500_v27 }
 0x1c3   : > { %507 = vadd.xlane.f32.xlu0 %v506_v26 }
 0x1c6   : > { %516 = vadd.xlane.f32.xlu1 %v515_v31 }
 0x1c7   : > { %510 = vadd.xlane.f32.xlu0 %v509_v32 }
 0x24b   : > { %v514_v33 = vpop.xlane.xlu1 %513 }
 0x24c   : > { %521 = vst.msk [vmem:[%s965_s15 + $0x10] sm:$0xff] %vm518_vm4, %v514_v33  ;;  %v508_v34 = vpop.xlane.xlu0 %507 }
 0x24d   : > { %519 = vst.msk [vmem:[%s965_s15] sm:$0xff] %vm518_vm4, %v508_v34 }
 0x24f   : > { %v517_v35 = vpop.xlane.xlu1 %516 }
 0x250   : > { %522 = vst.msk [vmem:[%s965_s15 + $0x18] sm:$0xff] %vm518_vm4, %v517_v35  ;;  %v511_v36 = vpop.xlane.xlu0 %510 }
 0x251   : > { %520 = vst.msk [vmem:[%s965_s15 + $0x8] sm:$0xff] %vm518_vm4, %v511_v36 }
 0x252 PF: > { %s23_s26 = sadd.s32 1, %s834_s26   ;;  %s1095_s20 = smov %s810_s21 }
 0x253   : > { %p20_p3 = scmp.ge.s32.totalorder %s23_s26, 8   ;;  %s1096_s21 = smov %s814_s0 }
 0x254   : > { %s1097_s0 = smov %s934_s10  ;;  %s1098_s22 = smov %s826_s24 }
 0x255   : > { %s1099_s23 = smov %s830_s25  ;;  %s1100_s24 = smov %s1103_s28 }
 0x256   : > { %s1101_s25 = smov %s1107_s29  ;;  %22 = sbr.rel (!%p20_p3) target bundleno = 20 (0x14), region = 85 }
 0x25b   :  { %544 = vsyncpa [#allocation6], 1 }
 0x25c   :  { %546 = vsyncpa [#allocation6 + $0x1], 1 }

</bundles_post_ra>
